<compile_context>
chip_gen: v6e
topology: v6e:2x2x1
jax: 0.10.0
libtpu: 0.0.40
codegen_flags: <defaults>
</compile_context>

<pallas_src>
from functools import partial

import jax
import jax.numpy as jnp
from jax.experimental import pallas as pl
from jax.experimental.pallas import tpu as pltpu

LANE = 128        # lane width / MXU column width
HIDDEN = 128      # DQN hidden width (already lane-aligned)
GRANULE = 16      # bf16 sublane packing granule for batch tiles


def _round_up(x, m):
    return (x + m - 1) // m * m


# --------------------------------------------------------------------------- #
# Kernels
# --------------------------------------------------------------------------- #
def _mlp(x, w1, b1, w2, b2, w3, b3):
    """Fused 3-layer MLP on one batch tile. bf16 operands, f32 accumulation."""
    h1 = jnp.maximum(
        jnp.dot(x, w1, preferred_element_type=jnp.float32) + b1, 0.0
    ).astype(jnp.bfloat16)
    h2 = jnp.maximum(
        jnp.dot(h1, w2, preferred_element_type=jnp.float32) + b2, 0.0
    ).astype(jnp.bfloat16)
    return jnp.dot(h2, w3, preferred_element_type=jnp.float32) + b3  # f32 (tm, n_pad)


def dqn_q_kernel(x_ref, w1_ref, b1_ref, w2_ref, b2_ref, w3_ref, b3_ref, q_ref):
    q_ref[...] = _mlp(
        x_ref[...], w1_ref[...], b1_ref[...], w2_ref[...],
        b2_ref[...], w3_ref[...], b3_ref[...],
    )


def make_act_kernel(n_actions):
    """Kernel that emits greedy actions only (no Q writeback to HBM)."""

    def dqn_act_kernel(x_ref, w1_ref, b1_ref, w2_ref, b2_ref, w3_ref, b3_ref, a_ref):
        q = _mlp(
            x_ref[...], w1_ref[...], b1_ref[...], w2_ref[...],
            b2_ref[...], w3_ref[...], b3_ref[...],
        )
        n_pad = q.shape[-1]
        col = jax.lax.broadcasted_iota(jnp.int32, q.shape, 1)
        q_m = jnp.where(col < n_actions, q, -jnp.inf)       # mask padded action lanes
        m = jnp.max(q_m, axis=-1, keepdims=True)             # XLU lane reduce
        idx = jnp.where(q_m == m, col, n_pad)                # first index of the max
        a_ref[...] = jnp.min(idx, axis=-1, keepdims=True).astype(jnp.int32)

    return dqn_act_kernel


# --------------------------------------------------------------------------- #
# Wrappers
# --------------------------------------------------------------------------- #
def _tiling(batch, block_m):
    """Pick (tm, b_pad): >=2 blocks when possible (v7x megacore), bounded pad waste."""
    if batch <= 2 * GRANULE:
        return batch, batch                      # single exact block, zero padding
    b_pad0 = _round_up(batch, GRANULE)
    tm = min(block_m, max(GRANULE, (b_pad0 // 2) // GRANULE * GRANULE))
    b_pad = _round_up(batch, tm)
    # Bound ragged-batch waste to <= tm/2 by shrinking the tile.
    while tm > GRANULE and (b_pad - batch) > tm // 2:
        tm = max(GRANULE, (tm // 2) // GRANULE * GRANULE)
        b_pad = _round_up(batch, tm)
    return tm, b_pad


def _in_specs(tm, params):
    n_obs, hidden = params["w1"].shape
    n_pad = params["w3"].shape[1]
    pinned = lambda i: (0, 0)  # weights/biases stay VMEM-resident across the grid
    return [
        pl.BlockSpec((tm, n_obs), lambda i: (i, 0)),   # x tile streams over batch
        pl.BlockSpec((n_obs, hidden), pinned),          # w1 (unpadded K)
        pl.BlockSpec((1, hidden), pinned),              # b1
        pl.BlockSpec((hidden, hidden), pinned),         # w2
        pl.BlockSpec((1, hidden), pinned),              # b2
        pl.BlockSpec((hidden, n_pad), pinned),          # w3 (N padded to 128)
        pl.BlockSpec((1, n_pad), pinned),               # b3
    ]


def _prep_x(x, b_pad):
    xb = x.astype(jnp.bfloat16)
    if b_pad > x.shape[0]:
        xb = jnp.pad(xb, ((0, b_pad - x.shape[0]), (0, 0)))
    return xb


@partial(jax.jit, static_argnames=("n_actions", "block_m"))
def dqn_forward(x, params, *, n_actions, block_m=512):
    """Q-values [B, n_actions], matching DQN.forward semantics."""
    batch = x.shape[0]
    n_pad = params["w3"].shape[1]
    tm, b_pad = _tiling(batch, block_m)
    xb = _prep_x(x, b_pad)
    q = pl.pallas_call(
        dqn_q_kernel,
        out_shape=jax.ShapeDtypeStruct((b_pad, n_pad), jnp.float32),
        grid=(b_pad // tm,),
        in_specs=_in_specs(tm, params),
        out_specs=pl.BlockSpec((tm, n_pad), lambda i: (i, 0)),
        compiler_params=pltpu.CompilerParams(dimension_semantics=("parallel",)),
    )(xb, params["w1"], params["b1"], params["w2"], params["b2"],
      params["w3"], params["b3"])
    # TODO(synk): for a fully fused consumer, take the padded Q slab directly
    # instead of slicing here.
    return q[:batch, :n_actions]


@partial(jax.jit, static_argnames=("n_actions", "block_m"))
def dqn_act(x, params, *, n_actions, block_m=512):
    """Greedy actions [B] int32, argmax fused into the kernel (acting path)."""
    batch = x.shape[0]
    tm, b_pad = _tiling(batch, block_m)
    xb = _prep_x(x, b_pad)
    a = pl.pallas_call(
        make_act_kernel(n_actions),
        out_shape=jax.ShapeDtypeStruct((b_pad, 1), jnp.int32),
        grid=(b_pad // tm,),
        in_specs=_in_specs(tm, params),
        out_specs=pl.BlockSpec((tm, 1), lambda i: (i, 0)),
        compiler_params=pltpu.CompilerParams(dimension_semantics=("parallel",)),
    )(xb, params["w1"], params["b1"], params["w2"], params["b2"],
      params["w3"], params["b3"])
    return a[:batch, 0]


# --------------------------------------------------------------------------- #
# Params / reference
# --------------------------------------------------------------------------- #
def init_dqn_params(key, n_observations, n_actions, hidden=HIDDEN):
    """PyTorch-style U(-1/sqrt(fan_in), 1/sqrt(fan_in)) init.

    Weights are stored transposed ([in, out]) in bf16; only the action dim is
    zero-padded to a multiple of 128 (lane-dense output). Biases stay f32.
    """
    n_pad = _round_up(n_actions, LANE)
    ks = jax.random.split(key, 6)

    def linear(kw, kb, fan_in, fan_out, fan_out_pad):
        bound = 1.0 / (float(fan_in) ** 0.5)
        w = jax.random.uniform(kw, (fan_in, fan_out), jnp.float32, -bound, bound)
        b = jax.random.uniform(kb, (1, fan_out), jnp.float32, -bound, bound)
        w_p = (jnp.zeros((fan_in, fan_out_pad), jnp.float32)
               .at[:, :fan_out].set(w).astype(jnp.bfloat16))
        b_p = jnp.zeros((1, fan_out_pad), jnp.float32).at[:, :fan_out].set(b)
        return w_p, b_p

    w1, b1 = linear(ks[0], ks[1], n_observations, hidden, hidden)
    w2, b2 = linear(ks[2], ks[3], hidden, hidden, hidden)
    w3, b3 = linear(ks[4], ks[5], hidden, n_actions, n_pad)
    return {"w1": w1, "b1": b1, "w2": w2, "b2": b2, "w3": w3, "b3": b3}


def _reference(x, params, n_actions):
    """Pure-JAX reference mirroring the kernel math (bf16 operands, f32 acc)."""
    xb = x.astype(jnp.bfloat16)
    h1 = jnp.maximum(
        jnp.dot(xb, params["w1"], preferred_element_type=jnp.float32) + params["b1"], 0.0
    ).astype(jnp.bfloat16)
    h2 = jnp.maximum(
        jnp.dot(h1, params["w2"], preferred_element_type=jnp.float32) + params["b2"], 0.0
    ).astype(jnp.bfloat16)
    q = jnp.dot(h2, params["w3"], preferred_element_type=jnp.float32) + params["b3"]
    return q[:, :n_actions]


if __name__ == "__main__":
    key = jax.random.PRNGKey(0)
    k_params, k_x1, k_x2 = jax.random.split(key, 3)

    n_observations = 4   # e.g. CartPole observation size
    n_actions = 2        # e.g. CartPole action count
    params = init_dqn_params(k_params, n_observations, n_actions)

    # 1) Tiny action-selection batch (B=2): single exact block, zero batch/feature
    #    padding, plus the fused in-kernel argmax acting path.
    x_small = jax.random.normal(k_x1, (2, n_observations), jnp.float32)
    q_small = jax.block_until_ready(dqn_forward(x_small, params, n_actions=n_actions))
    a_small = jax.block_until_ready(dqn_act(x_small, params, n_actions=n_actions))
    ref_small = _reference(x_small, params, n_actions)
    assert q_small.shape == (2, n_actions)
    assert jnp.allclose(q_small, ref_small, atol=1e-2, rtol=1e-2)
    assert jnp.array_equal(a_small, jnp.argmax(q_small, axis=-1).astype(jnp.int32))

    # 2) Replay-style batch (B=256): tm=128 -> grid=(2,), so both v7x TensorCores
    #    get a block; weights pinned VMEM-resident, x/Q tiles double-buffered.
    x_big = jax.random.normal(k_x2, (256, n_observations), jnp.float32)
    q_big = jax.block_until_ready(dqn_forward(x_big, params, n_actions=n_actions))
    ref_big = _reference(x_big, params, n_actions)
    assert q_big.shape == (256, n_actions)
    assert jnp.allclose(q_big, ref_big, atol=1e-2, rtol=1e-2)

    print("KERNEL_OK")
</pallas_src>

<mosaic_0001>
module attributes {stable_mosaic.version = 11 : i64} {
  func.func @dqn_q_kernel(%arg0: i32, %arg1: memref<2x4xbf16, #tpu.memory_space<vmem>>, %arg2: memref<4x128xbf16, #tpu.memory_space<vmem>>, %arg3: memref<1x128xf32, #tpu.memory_space<vmem>>, %arg4: memref<128x128xbf16, #tpu.memory_space<vmem>>, %arg5: memref<1x128xf32, #tpu.memory_space<vmem>>, %arg6: memref<128x128xbf16, #tpu.memory_space<vmem>>, %arg7: memref<1x128xf32, #tpu.memory_space<vmem>>, %arg8: memref<2x128xf32, #tpu.memory_space<vmem>>) attributes {dimension_semantics = [#tpu.dimension_semantics<parallel>], iteration_bounds = array<i64: 1>, scalar_prefetch = 0 : i64, scratch_operands = 0 : i64, tpu.core_type = #tpu.core_type<tc>, window_params = [{transform_indices = @transform_0, window_bounds = array<i64: 2, 4>}, {pipeline_mode = #tpu.pipeline_mode<synchronous>, transform_indices = @transform_1, window_bounds = array<i64: 4, 128>}, {pipeline_mode = #tpu.pipeline_mode<synchronous>, transform_indices = @transform_2, window_bounds = array<i64: 1, 128>}, {pipeline_mode = #tpu.pipeline_mode<synchronous>, transform_indices = @transform_3, window_bounds = array<i64: 128, 128>}, {pipeline_mode = #tpu.pipeline_mode<synchronous>, transform_indices = @transform_4, window_bounds = array<i64: 1, 128>}, {pipeline_mode = #tpu.pipeline_mode<synchronous>, transform_indices = @transform_5, window_bounds = array<i64: 128, 128>}, {pipeline_mode = #tpu.pipeline_mode<synchronous>, transform_indices = @transform_6, window_bounds = array<i64: 1, 128>}, {transform_indices = @transform_7, window_bounds = array<i64: 2, 128>}]} {
    %c0 = arith.constant 0 : index
    %c0_0 = arith.constant 0 : index
    %0 = vector.load %arg1[%c0, %c0_0] : memref<2x4xbf16, #tpu.memory_space<vmem>>, vector<2x4xbf16>
    %c0_1 = arith.constant 0 : index
    %c0_2 = arith.constant 0 : index
    %1 = vector.load %arg2[%c0_1, %c0_2] : memref<4x128xbf16, #tpu.memory_space<vmem>>, vector<4x128xbf16>
    %c0_3 = arith.constant 0 : index
    %c0_4 = arith.constant 0 : index
    %2 = vector.load %arg3[%c0_3, %c0_4] : memref<1x128xf32, #tpu.memory_space<vmem>>, vector<1x128xf32>
    %c0_5 = arith.constant 0 : index
    %c0_6 = arith.constant 0 : index
    %3 = vector.load %arg4[%c0_5, %c0_6] : memref<128x128xbf16, #tpu.memory_space<vmem>>, vector<128x128xbf16>
    %c0_7 = arith.constant 0 : index
    %c0_8 = arith.constant 0 : index
    %4 = vector.load %arg5[%c0_7, %c0_8] : memref<1x128xf32, #tpu.memory_space<vmem>>, vector<1x128xf32>
    %c0_9 = arith.constant 0 : index
    %c0_10 = arith.constant 0 : index
    %5 = vector.load %arg6[%c0_9, %c0_10] : memref<128x128xbf16, #tpu.memory_space<vmem>>, vector<128x128xbf16>
    %c0_11 = arith.constant 0 : index
    %c0_12 = arith.constant 0 : index
    %6 = vector.load %arg7[%c0_11, %c0_12] : memref<1x128xf32, #tpu.memory_space<vmem>>, vector<1x128xf32>
    %cst = arith.constant dense<0.000000e+00> : vector<2x128xf32>
    %7 = tpu.matmul %0, %1, %cst {dimension_numbers = #tpu.dot_dimension_numbers<[1], [0], [0], [1], [0, 0, 1, 1], [], []>} : vector<2x4xbf16>, vector<4x128xbf16>, vector<2x128xf32> -> vector<2x128xf32>
    %8 = vector.broadcast %2 : vector<1x128xf32> to vector<2x128xf32>
    %9 = arith.addf %7, %8 : vector<2x128xf32>
    %cst_13 = arith.constant 0.000000e+00 : f32
    %10 = vector.broadcast %cst_13 : f32 to vector<2x128xf32>
    %11 = arith.maximumf %9, %10 : vector<2x128xf32>
    %12 = arith.truncf %11 : vector<2x128xf32> to vector<2x128xbf16>
    %cst_14 = arith.constant dense<0.000000e+00> : vector<2x128xf32>
    %13 = tpu.matmul %12, %3, %cst_14 {dimension_numbers = #tpu.dot_dimension_numbers<[1], [0], [0], [1], [0, 0, 1, 1], [], []>} : vector<2x128xbf16>, vector<128x128xbf16>, vector<2x128xf32> -> vector<2x128xf32>
    %14 = vector.broadcast %4 : vector<1x128xf32> to vector<2x128xf32>
    %15 = arith.addf %13, %14 : vector<2x128xf32>
    %cst_15 = arith.constant 0.000000e+00 : f32
    %16 = vector.broadcast %cst_15 : f32 to vector<2x128xf32>
    %17 = arith.maximumf %15, %16 : vector<2x128xf32>
    %18 = arith.truncf %17 : vector<2x128xf32> to vector<2x128xbf16>
    %cst_16 = arith.constant dense<0.000000e+00> : vector<2x128xf32>
    %19 = tpu.matmul %18, %5, %cst_16 {dimension_numbers = #tpu.dot_dimension_numbers<[1], [0], [0], [1], [0, 0, 1, 1], [], []>} : vector<2x128xbf16>, vector<128x128xbf16>, vector<2x128xf32> -> vector<2x128xf32>
    %20 = vector.broadcast %6 : vector<1x128xf32> to vector<2x128xf32>
    %21 = arith.addf %19, %20 : vector<2x128xf32>
    %c0_17 = arith.constant 0 : index
    %c0_18 = arith.constant 0 : index
    %22 = vector.load %arg8[%c0_17, %c0_18] : memref<2x128xf32, #tpu.memory_space<vmem>>, vector<2x128xf32>
    tpu.vector_store %arg8[%c0_17, %c0_18], %21 {strides = array<i32>} : memref<2x128xf32, #tpu.memory_space<vmem>>, vector<2x128xf32>,
    return
  }
  func.func @transform_0(%arg0: i32) -> (i32, i32) {
    %c0_i32 = arith.constant 0 : i32
    %c0_i32_0 = arith.constant 0 : i32
    return %arg0, %c0_i32 : i32, i32
  }
  func.func @transform_1(%arg0: i32) -> (i32, i32) {
    %c0_i32 = arith.constant 0 : i32
    %c0_i32_0 = arith.constant 0 : i32
    %c0_i32_1 = arith.constant 0 : i32
    return %c0_i32, %c0_i32_0 : i32, i32
  }
  func.func @transform_2(%arg0: i32) -> (i32, i32) {
    %c0_i32 = arith.constant 0 : i32
    %c0_i32_0 = arith.constant 0 : i32
    %c0_i32_1 = arith.constant 0 : i32
    return %c0_i32, %c0_i32_0 : i32, i32
  }
  func.func @transform_3(%arg0: i32) -> (i32, i32) {
    %c0_i32 = arith.constant 0 : i32
    %c0_i32_0 = arith.constant 0 : i32
    %c0_i32_1 = arith.constant 0 : i32
    return %c0_i32, %c0_i32_0 : i32, i32
  }
  func.func @transform_4(%arg0: i32) -> (i32, i32) {
    %c0_i32 = arith.constant 0 : i32
    %c0_i32_0 = arith.constant 0 : i32
    %c0_i32_1 = arith.constant 0 : i32
    return %c0_i32, %c0_i32_0 : i32, i32
  }
  func.func @transform_5(%arg0: i32) -> (i32, i32) {
    %c0_i32 = arith.constant 0 : i32
    %c0_i32_0 = arith.constant 0 : i32
    %c0_i32_1 = arith.constant 0 : i32
    return %c0_i32, %c0_i32_0 : i32, i32
  }
  func.func @transform_6(%arg0: i32) -> (i32, i32) {
    %c0_i32 = arith.constant 0 : i32
    %c0_i32_0 = arith.constant 0 : i32
    %c0_i32_1 = arith.constant 0 : i32
    return %c0_i32, %c0_i32_0 : i32, i32
  }
  func.func @transform_7(%arg0: i32) -> (i32, i32) {
    %c0_i32 = arith.constant 0 : i32
    %c0_i32_0 = arith.constant 0 : i32
    return %arg0, %c0_i32 : i32, i32
  }
}

</mosaic_0001>

<bundles_post_ra>
// kernel: dqn_forward.1
= control target key start
LH: loop header
LB: loop body
LE: loop exit
PB: predicated region body
PF: predicated region fallthrough
CT: control target
= control target key end

     0   :  { %12 = vsyncpa [#allocation3], 0  ;;  %s625_s0 = inlined_call_operand.vmem [shape: bf16[2,4], index: 0, kind: input, shape index: {}]   ;;  %s626_s1 = inlined_call_operand.vmem [shape: bf16[4,128], index: 1, kind: input, shape index: {}]   ;;  %s627_s2 = inlined_call_operand.vmem [shape: f32[1,128], index: 2, kind: input, shape index: {}]   ;;  %s628_s3 = inlined_call_operand.hbm [shape: bf16[128,128], index: 3, kind: input, shape index: {}]   ;;  %s629_s4 = inlined_call_operand.vmem [shape: f32[1,128], index: 4, kind: input, shape index: {}]   ;;  %s630_s5 = inlined_call_operand.hbm [shape: bf16[128,128], index: 5, kind: input, shape index: {}]   ;;  %s631_s6 = inlined_call_operand.vmem [shape: f32[1,128], index: 6, kind: input, shape index: {}]   ;;  %s632_s7 = inlined_call_operand.hbm [shape: f32[2,128], index: 7, kind: output, shape index: {}]  }
   0x1   :  { %13 = vsyncpa [#allocation6], 0 }
   0x2   :  { %14 = vsyncpa [#allocation4], 0  ;;  %s531_s24 = smov [#allocation2]  }
   0x3   :  { %s26_s25 = sshll.u32 %s531_s24, 4  ;;  %s27_s25 = int_to_ptr.vmem [resolvable:$true] %s26_s25 }
   0x4   :  { %s473_s26 = scalar_lea.vmem %s27_s25, 1024  ;;  %p478_p1 = scmp.lt.s32.totalorder %s27_s25, %s27_s25 }
   0x5   :  { %p474_p0 = scmp.ne.s32.totalorder %s27_s25, %s473_s26  ;;  %p479_p2 = scmp.lt.s32.totalorder %s473_s26, %s473_s26 }
   0x7   :  { %p480_p3 = por %p479_p2, %p478_p1 }
   0x9   :  { %p481_p4 = pnand %p480_p3, %p474_p0 }
   0xb   :  { %484 = shalt.err (!%p481_p4)
}
   0xc   :  { %s532_s27 = smov 64   ;;  %s533_s28 = smov 4  }
   0xd   :  { %32 = dma.hbm_to_vmem [thread:$0]  %s628_s3, 1024, %s27_s25, [#allocation3], %s532_s27, %s532_s27, %s533_s28  }
   0xe   :  { %s534_s8 = smov [#allocation5]  }
   0xf   :  { %s40_s9 = sshll.u32 %s534_s8, 4  ;;  %s41_s9 = int_to_ptr.vmem [resolvable:$true] %s40_s9 }
  0x10   :  { %s493_s10 = scalar_lea.vmem %s41_s9, 1024  ;;  %p498_p6 = scmp.lt.s32.totalorder %s41_s9, %s41_s9 }
  0x11   :  { %p494_p5 = scmp.ne.s32.totalorder %s41_s9, %s493_s10  ;;  %p499_p7 = scmp.lt.s32.totalorder %s493_s10, %s493_s10 }
  0x13   :  { %p500_p8 = por %p499_p7, %p498_p6 }
  0x15   :  { %p501_p9 = pnand %p500_p8, %p494_p5 }
  0x17   :  { %504 = shalt.err (!%p501_p9)
}
  0x18   :  { %46 = dma.hbm_to_vmem [thread:$0]  %s630_s5, 1024, %s41_s9, [#allocation6], %s532_s27, %s532_s27, %s533_s28  }
  0x19   :  { %525 = dma.done.wait [#allocation3], 1024  }
  0x1a   :  { %526 = vsyncadd [#allocation3], 4294966272 }
  0x1b   :  { %527 = dma.done.wait [#allocation6], 1024  }
  0x1c   :  { %528 = vsyncadd [#allocation6], 4294966272  ;;  %v535_v0 = vmov 0.0   ;;  %vm536_vm0 = vmmov 0   ;;  %vm103_vm1 = vcmask 1041408   ;;  %vm99_vm2 = vcmask 31744  }
  0x1d   :  { %396 = vmatprep.subr.bf16.mxu0 %v535_v0  ;;  %398 = vmatprep.mubr.msk.bf16.mxu0 %vm536_vm0, %v535_v0  ;;  %v57_v1 = vld [vmem:[%s626_s1] sm:$0x3]  ;;  %v449_v3 = vld [vmem:[#allocation2 + $0x38] sm:$0xff]   ;;  %v450_v5 = vld [vmem:[#allocation2 + $0x30] sm:$0xff]   ;;  %s537_s18 = smov [#allocation7]  }
  0x1e   :  { %402 = vmatprep.subr.bf16.mxu1 %v535_v0  ;;  %418 = vmatprep.mubr.msk.bf16.mxu1 %vm536_vm0, %v535_v0  ;;  %v105_v2 = vsel %vm103_vm1, %v57_v1, 0  ;;  %v56_v4 = vld [vmem:[%s625_s0] sm:$0x1]  ;;  %v451_v6 = vld [vmem:[#allocation2 + $0x28] sm:$0xff]   ;;  %v453_v8 = vld [vmem:[#allocation2 + $0x18] sm:$0xff]   ;;  %s346_s19 = sshll.u32 %s537_s18, 4  ;;  %s347_s19 = int_to_ptr.vmem [resolvable:$true] %s346_s19 }
  0x1f   :  { %397 = vmatpush3.bf16.msra.mxu0 %v105_v2  ;;  %403 = vmatpush3.bf16.msra.mxu1 %v449_v3  ;;  %v452_v7 = vld [vmem:[#allocation2 + $0x20] sm:$0xff]   ;;  %v454_v9 = vld [vmem:[#allocation2 + $0x10] sm:$0xff]   ;;  %v455_v10 = vld [vmem:[#allocation2 + $0x8] sm:$0xff]   ;;  %p510_p11 = scmp.lt.s32.totalorder %s347_s19, %s347_s19 }
  0x20   :  { %422 = vmatprep.subr.bf16.mxu0 %v535_v0  ;;  %404 = vmatprep.subr.bf16.mxu1 %v535_v0  ;;  %v456_v11 = vld [vmem:[#allocation2] sm:$0xff]   ;;  %v457_v12 = vld [vmem:[#allocation5 + $0x38] sm:$0xff]   ;;  %v458_v13 = vld [vmem:[#allocation5 + $0x30] sm:$0xff]  }
  0x21   :  { %v459_v14 = vld [vmem:[#allocation5 + $0x28] sm:$0xff]   ;;  %v460_v15 = vld [vmem:[#allocation5 + $0x20] sm:$0xff]   ;;  %v461_v16 = vld [vmem:[#allocation5 + $0x18] sm:$0xff]  }
  0x22   :  { %399 = vmatmul.mubr.msk.bf16.vlgmr.msra.gmra.mxu0 %vm99_vm2, %v56_v4  ;;  %v462_v17 = vld [vmem:[#allocation5 + $0x10] sm:$0xff]   ;;  %v356_v18 = vld [vmem:[%s627_s2] ss:$0 sm:$0xff]  ;;  %v463_v26 = vld [vmem:[#allocation5 + $0x8] sm:$0xff]  }
  0x23   :  { %438 = vmatprep.mubr.msk.bf16.mxu0 %vm536_vm0, %v535_v0  ;;  %405 = vmatpush3.bf16.msra.mxu1 %v450_v5  ;;  %v464_v27 = vld [vmem:[#allocation5] sm:$0xff]  }
  0x24   :  { %406 = vmatprep.subr.bf16.mxu1 %v535_v0  ;;  %423 = vmatpush3.bf16.msra.mxu0 %v457_v12  ;;  %v358_v28 = vld [vmem:[%s629_s4] ss:$0 sm:$0xff]  ;;  %s505_s4 = scalar_lea.vmem %s347_s19, 32 }
  0x25   :  { %424 = vmatprep.subr.bf16.mxu0 %v535_v0  ;;  %v367_v36 = vld [vmem:[%s631_s6] ss:$0 sm:$0xff]  ;;  %p506_p10 = scmp.ne.s32.totalorder %s347_s19, %s505_s4  ;;  %p511_p12 = scmp.lt.s32.totalorder %s505_s4, %s505_s4 }
  0x27   :  { %407 = vmatpush3.bf16.msra.mxu1 %v451_v6  ;;  %p512_p13 = por %p511_p12, %p510_p11 }
  0x28   :  { %408 = vmatprep.subr.bf16.mxu1 %v535_v0  ;;  %425 = vmatpush3.bf16.msra.mxu0 %v458_v13 }
  0x29   :  { %426 = vmatprep.subr.bf16.mxu0 %v535_v0  ;;  %p513_p0 = pnand %p512_p13, %p506_p10 }
  0x2b   :  { %409 = vmatpush3.bf16.msra.mxu1 %v452_v7 }
  0x2c   :  { %410 = vmatprep.subr.bf16.mxu1 %v535_v0  ;;  %427 = vmatpush3.bf16.msra.mxu0 %v459_v14 }
  0x2d   :  { %428 = vmatprep.subr.bf16.mxu0 %v535_v0 }
  0x2f   :  { %411 = vmatpush3.bf16.msra.mxu1 %v453_v8 }
  0x30   :  { %412 = vmatprep.subr.bf16.mxu1 %v535_v0  ;;  %429 = vmatpush3.bf16.msra.mxu0 %v460_v15 }
  0x31   :  { %430 = vmatprep.subr.bf16.mxu0 %v535_v0 }
  0x33   :  { %413 = vmatpush3.bf16.msra.mxu1 %v454_v9 }
  0x34   :  { %414 = vmatprep.subr.bf16.mxu1 %v535_v0  ;;  %431 = vmatpush3.bf16.msra.mxu0 %v461_v16 }
  0x35   :  { %432 = vmatprep.subr.bf16.mxu0 %v535_v0 }
  0x37   :  { %415 = vmatpush3.bf16.msra.mxu1 %v455_v10 }
  0x38   :  { %416 = vmatprep.subr.bf16.mxu1 %v535_v0  ;;  %433 = vmatpush3.bf16.msra.mxu0 %v462_v17 }
  0x39   :  { %434 = vmatprep.subr.bf16.mxu0 %v535_v0 }
  0x3b   :  { %417 = vmatpush3.bf16.msra.mxu1 %v456_v11 }
  0x3c   :  { %435 = vmatpush3.bf16.msra.mxu0 %v463_v26 }
  0x3d   :  { %436 = vmatprep.subr.bf16.mxu0 %v535_v0 }
  0x40   :  { %437 = vmatpush3.bf16.msra.mxu0 %v464_v27 }
  0xe2   :  { %v141_v19 = vpop.f32.mrf.mxu0 }
  0xe3   :  { %v142_v20 = vadd.f32 %v356_v18, %v141_v19 }
  0xe4   :  { %v400_v21 = vpop.f32.mrf.mxu0 }
  0xe5   :  { %v147_v22 = vmax.f32 %v142_v20, 0.0 }
  0xe6   :  { %v144_v23 = vpop.f32.mrf.mxu0 }
  0xe7   :  { %v148_v24 = vpack.c.bf16 %v147_v22, %v147_v22 }
  0xe8   :  { %v401_v25 = vpop.f32.mrf.mxu0 }
  0xe9   :  { %419 = vmatmul.mubr.bf16.vlgmr.msra.gmra.mxu1 %v148_v24 }
 0x1a9   :  { %v237_v29 = vpop.f32.mrf.mxu1 }
 0x1aa   :  { %v238_v30 = vadd.f32 %v358_v28, %v237_v29 }
 0x1ab   :  { %v420_v31 = vpop.f32.mrf.mxu1 }
 0x1ac   :  { %v243_v32 = vmax.f32 %v238_v30, 0.0 }
 0x1ad   :  { %v240_v33 = vpop.f32.mrf.mxu1 }
 0x1ae   :  { %v244_v34 = vpack.c.bf16 %v243_v32, %v243_v32 }
 0x1af   :  { %v421_v35 = vpop.f32.mrf.mxu1 }
 0x1b0   :  { %439 = vmatmul.mubr.bf16.vlgmr.msra.gmra.mxu0 %v244_v34 }
 0x270   :  { %v333_v37 = vpop.f32.mrf.mxu0 }
 0x271   :  { %v334_v38 = vadd.f32 %v367_v36, %v333_v37 }
 0x272   :  { %v440_v39 = vpop.f32.mrf.mxu0 }
 0x273   :  { %339 = vst [vmem:[#allocation7] sm:$0x3] %v334_v38 }
 0x274   :  { %v336_v40 = vpop.f32.mrf.mxu0 }
 0x275   :  { %516 = shalt.err (!%p513_p0)
}
 0x276   :  { %349 = dma.vmem_to_hbm [thread:$0]  %s347_s19, 32, %s632_s7, [#allocation4]   ;;  %v441_v41 = vpop.f32.mrf.mxu0 }
 0x277   :  { %529 = dma.done.wait [#allocation4], 32  }
 0x278   :  { %530 = vsyncadd [#allocation4], 4294967264 }
 0x279   :  { %353 = vsyncpa [#allocation3], 1 }
 0x27a   :  { %354 = vsyncpa [#allocation6], 1 }
 0x27b   :  { %355 = vsyncpa [#allocation4], 1 }

</bundles_post_ra>
